<compile_context>
chip_gen: v7x
topology: tpu7x:2x2x1
jax: 0.10.0
libtpu: 0.0.40
codegen_flags: <defaults>
</compile_context>

<pallas_src>
import math

import jax
import jax.numpy as jnp
from jax.experimental import pallas as pl
from jax.experimental.pallas import tpu as pltpu


def _round_up(n: int, m: int) -> int:
    return ((n + m - 1) // m) * m


def _round_down(n: int, m: int) -> int:
    return (n // m) * m


def _vmem_budget_and_limit():
    """Generation-aware (working-set budget, scoped VMEM limit) in bytes."""
    phys = None
    try:
        info = pltpu.get_tpu_info()
        phys = getattr(info, "vmem_capacity_bytes", None)
    except Exception:
        phys = None
    if phys is None:
        phys = 64 * 1024 * 1024  # conservative: assume smallest (v7x) VMEM
    if phys >= 96 * 1024 * 1024:          # v5e / v6e: 128 MiB physical VMEM
        return 48 * 1024 * 1024, 80 * 1024 * 1024
    return 24 * 1024 * 1024, 48 * 1024 * 1024   # v7x: 64 MiB physical VMEM


def make_pe_buffer(d_model: int, max_len: int = 5000) -> jnp.ndarray:
    """Sinusoidal positional-encoding buffer (1, max_len, d_model), matching the
    PyTorch __init__ (buffer setup = plain-JAX glue). Handles odd d_model
    gracefully (PyTorch would error there)."""
    position = jnp.arange(0, max_len, dtype=jnp.float32)[:, None]             # (L, 1)
    div_term = jnp.exp(
        jnp.arange(0, d_model, 2, dtype=jnp.float32) * (-math.log(10000.0) / d_model)
    )                                                                          # (ceil(D/2),)
    angles = position * div_term                                               # (L, ceil(D/2))
    pe = jnp.zeros((max_len, d_model), dtype=jnp.float32)
    pe = pe.at[:, 0::2].set(jnp.sin(angles))
    pe = pe.at[:, 1::2].set(jnp.cos(angles[:, : d_model // 2]))
    return pe[None, :, :]                                                      # (1, L, D)


def _pe_add_kernel(x_ref, pe_ref, o_ref):
    # Pure streaming broadcast-add.
    #   3-D path: x_ref (bb, ts, D), pe_ref (ts, D)   -> broadcast over bb
    #   flat path: x_ref (B,  t),    pe_ref (1,  t)   -> broadcast over B
    o_ref[...] = (x_ref[...] + pe_ref[...]).astype(o_ref.dtype)


def _forward_tiled_3d(x, pe, budget, limit, io_alias):
    """D is a multiple of 128: tile (seq, batch); pe tile shared across the
    batch block via an in-kernel broadcast."""
    B, S, D = x.shape
    item = jnp.dtype(x.dtype).itemsize  # pe already cast to x.dtype

    # --- sequence tile: budget-driven, rounded DOWN to a sublane multiple ---
    bytes_per_row_bb1 = 2 * 3 * D * item               # double-buffered x + out + pe
    ts = _round_down(max(8, budget // bytes_per_row_bb1), 8)
    ts = max(8, min(ts, _round_up(S, 8), 4096))

    # --- batch block: fill the remaining budget ---
    pe_bytes = 2 * ts * D * item                       # double-buffered pe tile
    per_b = 2 * 2 * ts * D * item                      # double-buffered x + out per batch row
    bb = (budget - pe_bytes) // per_b if budget > pe_bytes else 1
    bb = max(1, min(B, bb))

    grid = (pl.cdiv(S, ts), pl.cdiv(B, bb))            # batch blocks innermost

    # TODO(synk): for B==1 on v6e/v7x the pe tile could be generated in-kernel
    # (broadcasted_iota + sin/cos into VMEM scratch), dropping the pe HBM stream.
    return pl.pallas_call(
        _pe_add_kernel,
        out_shape=jax.ShapeDtypeStruct((B, S, D), x.dtype),
        grid_spec=pltpu.PrefetchScalarGridSpec(
            num_scalar_prefetch=0,
            grid=grid,
            in_specs=[
                pl.BlockSpec((bb, ts, D), lambda s, b: (b, s, 0)),
                # pe block index depends only on the seq tile; the squeezed
                # batch dim makes the kernel see a (ts, D) tile broadcast over bb.
                pl.BlockSpec((pl.Squeezed(), ts, D), lambda s, b: (0, s, 0)),
            ],
            out_specs=pl.BlockSpec((bb, ts, D), lambda s, b: (b, s, 0)),
        ),
        compiler_params=pltpu.CompilerParams(
            dimension_semantics=("parallel", "parallel"),   # both TCs usable on v7x
            vmem_limit_bytes=limit,
        ),
        input_output_aliases=io_alias,
    )(x, pe)


def _forward_flat_2d(x, pe, budget, limit, io_alias):
    """D not a multiple of 128 (e.g. D=32): flatten (S, D) into one lane-dense
    axis so output stores are unmasked full-lane vst."""
    B, S, D = x.shape
    max_len = pe.shape[1]
    N = S * D
    x2 = x.reshape(B, N)
    pe2 = pe.reshape(1, max_len * D)                   # row-major: pe2[:, :S*D] == pe[:, :S, :]

    item = jnp.dtype(x.dtype).itemsize
    # Account for sublane padding: a (B, t) block occupies round_up(B, 8) rows
    # in VMEM, the (1, t) pe block occupies 8 rows.
    rows = 2 * _round_up(B, 8) + 8                     # x + out + pe
    bytes_per_col = 2 * rows * item                    # double-buffered
    t = _round_down(max(128, budget // bytes_per_col), 128)
    t = max(128, min(t, _round_up(N, 128)))

    grid = (pl.cdiv(N, t),)

    # TODO(synk): for B < 8 with S*D % 128 == 0, batch could be folded into the
    # flattened axis (pe index_map = j % (S*D // t)) for fully 8x128-dense DMAs.
    out2 = pl.pallas_call(
        _pe_add_kernel,
        out_shape=jax.ShapeDtypeStruct((B, N), x.dtype),
        grid_spec=pltpu.PrefetchScalarGridSpec(
            num_scalar_prefetch=0,
            grid=grid,
            in_specs=[
                pl.BlockSpec((B, t), lambda j: (0, j)),
                pl.BlockSpec((1, t), lambda j: (0, j)),   # broadcast over B in-kernel
            ],
            out_specs=pl.BlockSpec((B, t), lambda j: (0, j)),
        ),
        compiler_params=pltpu.CompilerParams(
            dimension_semantics=("parallel",),
            vmem_limit_bytes=limit,
        ),
        input_output_aliases=io_alias,
    )(x2, pe2)
    return out2.reshape(B, S, D)


def positional_encoding_forward(x, pe, *, donate_x=False):
    """x: (B, S, D); pe: (1, max_len, D). Returns x + pe[:, :S] (PyTorch forward)."""
    B, S, D = x.shape
    assert pe.ndim == 3 and pe.shape[0] == 1 and pe.shape[2] == D
    assert S <= pe.shape[1], "sequence length exceeds max_len of the pe buffer"

    # Stream pe in the activation dtype: halves the pe HBM read for bf16 x.
    pe = pe.astype(x.dtype)
    budget, limit = _vmem_budget_and_limit()
    io_alias = {0: 0} if donate_x else {}

    if D % 128 == 0:
        return _forward_tiled_3d(x, pe, budget, limit, io_alias)
    return _forward_flat_2d(x, pe, budget, limit, io_alias)


if __name__ == "__main__":
    MAX_LEN = 64

    # Case 1: small d_model (D=32, not lane-aligned) -> lane-dense flattened path.
    B, S, D = 2, 8, 32
    x = jax.random.normal(jax.random.PRNGKey(0), (B, S, D), dtype=jnp.float32)
    pe = make_pe_buffer(D, MAX_LEN)
    out = jax.block_until_ready(positional_encoding_forward(x, pe))
    ref = x + pe[:, :S, :]
    assert out.shape == (B, S, D)
    assert jnp.allclose(out, ref, atol=1e-6, rtol=1e-6)

    # Case 2: lane-aligned d_model (D=128) -> 3-D tiled path with batch blocking.
    B2, S2, D2 = 2, 16, 128
    x2 = jax.random.normal(jax.random.PRNGKey(0), (B2, S2, D2), dtype=jnp.float32)
    pe2 = make_pe_buffer(D2, MAX_LEN)
    out2 = jax.block_until_ready(positional_encoding_forward(x2, pe2))
    ref2 = x2 + pe2[:, :S2, :]
    assert out2.shape == (B2, S2, D2)
    assert jnp.allclose(out2, ref2, atol=1e-6, rtol=1e-6)

    # Case 3: non-tile-aligned S (13) and B=3 -> exercises partial-block masking.
    B3, S3, D3 = 3, 13, 128
    x3 = jax.random.normal(jax.random.PRNGKey(0), (B3, S3, D3), dtype=jnp.float32)
    pe3 = make_pe_buffer(D3, MAX_LEN)
    out3 = jax.block_until_ready(positional_encoding_forward(x3, pe3))
    ref3 = x3 + pe3[:, :S3, :]
    assert jnp.allclose(out3, ref3, atol=1e-6, rtol=1e-6)

    # Case 4: bf16 activations -> pe pre-cast to bf16 (half the pe HBM stream).
    B4, S4, D4 = 2, 8, 128
    x4 = jax.random.normal(jax.random.PRNGKey(0), (B4, S4, D4), dtype=jnp.bfloat16)
    pe4 = make_pe_buffer(D4, MAX_LEN)
    out4 = jax.block_until_ready(positional_encoding_forward(x4, pe4))
    ref4 = x4 + pe4[:, :S4, :].astype(jnp.bfloat16)
    assert out4.dtype == jnp.bfloat16
    assert jnp.allclose(out4.astype(jnp.float32), ref4.astype(jnp.float32),
                        atol=1e-2, rtol=1e-2)

    print("KERNEL_OK")
</pallas_src>

<mosaic_0001>
module attributes {stable_mosaic.version = 11 : i64} {
  func.func @_pe_add_kernel(%arg0: i32, %arg1: memref<2x256xf32, #tpu.memory_space<vmem>>, %arg2: memref<1x256xf32, #tpu.memory_space<vmem>>, %arg3: memref<2x256xf32, #tpu.memory_space<vmem>>) attributes {dimension_semantics = [#tpu.dimension_semantics<parallel>], iteration_bounds = array<i64: 1>, scalar_prefetch = 0 : i64, scratch_operands = 0 : i64, tpu.core_type = #tpu.core_type<tc>, window_params = [{transform_indices = @transform_0, window_bounds = array<i64: 2, 256>}, {transform_indices = @transform_1, window_bounds = array<i64: 1, 256>}, {transform_indices = @transform_2, window_bounds = array<i64: 2, 256>}]} {
    %c0 = arith.constant 0 : index
    %c0_0 = arith.constant 0 : index
    %0 = vector.load %arg1[%c0, %c0_0] : memref<2x256xf32, #tpu.memory_space<vmem>>, vector<2x256xf32>
    %c0_1 = arith.constant 0 : index
    %c0_2 = arith.constant 0 : index
    %1 = vector.load %arg2[%c0_1, %c0_2] : memref<1x256xf32, #tpu.memory_space<vmem>>, vector<1x256xf32>
    %2 = vector.broadcast %1 : vector<1x256xf32> to vector<2x256xf32>
    %3 = arith.addf %0, %2 : vector<2x256xf32>
    %c0_3 = arith.constant 0 : index
    %c0_4 = arith.constant 0 : index
    %4 = vector.load %arg3[%c0_3, %c0_4] : memref<2x256xf32, #tpu.memory_space<vmem>>, vector<2x256xf32>
    tpu.vector_store %arg3[%c0_3, %c0_4], %3 {strides = array<i32>} : memref<2x256xf32, #tpu.memory_space<vmem>>, vector<2x256xf32>,
    return
  }
  func.func @transform_0(%arg0: i32) -> (i32, i32) {
    %c0_i32 = arith.constant 0 : i32
    %c0_i32_0 = arith.constant 0 : i32
    return %c0_i32, %arg0 : i32, i32
  }
  func.func @transform_1(%arg0: i32) -> (i32, i32) {
    %c0_i32 = arith.constant 0 : i32
    %c0_i32_0 = arith.constant 0 : i32
    return %c0_i32, %arg0 : i32, i32
  }
  func.func @transform_2(%arg0: i32) -> (i32, i32) {
    %c0_i32 = arith.constant 0 : i32
    %c0_i32_0 = arith.constant 0 : i32
    return %c0_i32, %arg0 : i32, i32
  }
}

</mosaic_0001>

<bundles_post_ra>
// kernel: tpu_custom_call.1
= control target key start
LH: loop header
LB: loop body
LE: loop exit
PB: predicated region body
PF: predicated region fallthrough
CT: control target
= control target key end

     0   :  { %7 = vsyncpa [#allocation3], 0  ;;  %s215_s0 = inlined_call_operand.hbm [shape: f32[2,256], index: 0, kind: input, shape index: {}]   ;;  %s216_s1 = inlined_call_operand.hbm [shape: f32[1,2048], index: 1, kind: input, shape index: {}]   ;;  %s217_s2 = inlined_call_operand.hbm [shape: f32[2,256], index: 2, kind: output, shape index: {}]  }
   0x1   :  { %8 = vsyncpa [#allocation6], 0 }
   0x2   :  { %9 = vsyncpa [#allocation4], 0  ;;  %s150_s9 = smov [#allocation2]   ;;  %s151_s11 = smov [#allocation5]  }
   0x3   :  { %s16_s10 = sshll.u32 %s150_s9, 4  ;;  %s26_s12 = sshll.u32 %s151_s11, 4  ;;  %s17_s10 = int_to_ptr.vmem [resolvable:$true] %s16_s10  ;;  %s169_s12 = int_to_ptr.vmem [resolvable:$true] %s26_s12 }
   0x4   :  { %s78_s15 = scalar_lea.hbm %s215_s0, 64 }
   0x5   :  { %p79_p0 = scmp.ne.s32.totalorder %s215_s0, %s78_s15  ;;  %p82_p1 = scmp.lt.u32.totalorder %s78_s15, %s215_s0 }
   0x7   :  { %p84_p2 = pnand %p82_p1, %p79_p0 }
   0x9   :  { %87 = shalt.err (!%p84_p2)
}
   0xa   :  { %s88_s20 = scalar_lea.vmem %s17_s10, 64  ;;  %p93_p4 = scmp.lt.s32.totalorder %s17_s10, %s17_s10 }
   0xb   :  { %p89_p3 = scmp.ne.s32.totalorder %s17_s10, %s88_s20  ;;  %p94_p5 = scmp.lt.s32.totalorder %s88_s20, %s88_s20 }
   0xd   :  { %p95_p6 = por %p94_p5, %p93_p4 }
   0xf   :  { %p96_p7 = pnand %p95_p6, %p89_p3 }
  0x11   :  { %99 = shalt.err (!%p96_p7)
}
  0x12   :  { %19 = dma.hbm_to_vmem [thread:$0]  %s215_s0, 64, %s17_s10, [#allocation3]  }
  0x13   :  { %s100_s25 = scalar_lea.hbm %s216_s1, 32  ;;  %s102_s30 = scalar_lea.hbm %s216_s1, 256 }
  0x14   :  { %p101_p8 = scmp.ne.s32.totalorder %s216_s1, %s100_s25  ;;  %p103_p9 = scmp.lt.u32.totalorder %s102_s30, %s100_s25 }
  0x15   :  { %p104_p10 = scmp.lt.u32.totalorder %s100_s25, %s216_s1 }
  0x17   :  { %p105_p11 = por %p104_p10, %p103_p9 }
  0x19   :  { %p106_p12 = pnand %p105_p11, %p101_p8 }
  0x1b   :  { %109 = shalt.err (!%p106_p12)
}
  0x1c   :  { %s110_s0 = scalar_lea.vmem %s169_s12, 32  ;;  %p115_p0 = scmp.lt.s32.totalorder %s169_s12, %s169_s12 }
  0x1d   :  { %p111_p13 = scmp.ne.s32.totalorder %s169_s12, %s110_s0  ;;  %p116_p1 = scmp.lt.s32.totalorder %s110_s0, %s110_s0 }
  0x1f   :  { %p117_p2 = por %p116_p1, %p115_p0 }
  0x21   :  { %p118_p3 = pnand %p117_p2, %p111_p13 }
  0x23   :  { %121 = shalt.err (!%p118_p3)
}
  0x24   :  { %29 = dma.hbm_to_vmem [thread:$0]  %s216_s1, 32, %s169_s12, [#allocation6]  }
  0x25   :  { %144 = dma.done.wait [#allocation3], 64  }
  0x26   :  { %145 = vsyncadd [#allocation3], 4294967232 }
  0x27   :  { %146 = dma.done.wait [#allocation6], 32  }
  0x28   :  { %147 = vsyncadd [#allocation6], 4294967264  ;;  %v39_v0 = vlaneseq  ;;  %v152_v1 = vmov 1983009808   ;;  %v37_v7 = vld [vmem:[#allocation5] sm:$0x3] }
  0x29   :  { %v49_v2 = vunpack.c.l.s4 %v152_v1  ;;  %v36_v12 = vld [vmem:[#allocation2] sm:$0xf]  ;;  %s153_s7 = smov [#allocation7]  }
  0x2a   :  { %v40_v3 = vshrl.u32 %v39_v0, 7  ;;  %s64_s8 = sshll.u32 %s153_s7, 4  ;;  %s65_s8 = int_to_ptr.vmem [resolvable:$true] %s64_s8 }
  0x2b   :  { %v50_v6 = vunpack.c.0.s8 %v49_v2  ;;  %s122_s1 = scalar_lea.vmem %s65_s8, 64  ;;  %p127_p5 = scmp.lt.s32.totalorder %s65_s8, %s65_s8 }
  0x2c   :  { %v41_v4 = vsub.s32 0, %v40_v3  ;;  %v45_v5 = vsub.s32 1, %v40_v3  ;;  %p123_p4 = scmp.ne.s32.totalorder %s65_s8, %s122_s1  ;;  %p128_p6 = scmp.lt.s32.totalorder %s122_s1, %s122_s1 }
  0x2d   :  { %v53_v10 = vsub.s32 %v50_v6, %v40_v3 }
  0x2e   :  { %v42_v8 = vrot.slane %v37_v7, %v41_v4  ;;  %v46_v9 = vrot.slane %v37_v7, %v45_v5  ;;  %p129_p7 = por %p128_p6, %p127_p5 }
  0x30   :  { %v47_v11 = vcombine.low %v42_v8, %v46_v9  ;;  %p130_p8 = pnand %p129_p7, %p123_p4 }
  0x32   :  { %v54_v13 = vrot.slane %v47_v11, %v53_v10 }
  0x34   :  { %v56_v14 = vadd.f32 %v54_v13, %v36_v12 }
  0x36   :  { %57 = vst [vmem:[#allocation7] sm:$0xf] %v56_v14 }
  0x37   :  { %133 = shalt.err (!%p130_p8)
}
  0x38   :  { %s134_s11 = scalar_lea.hbm %s217_s2, 64 }
  0x39   :  { %p135_p9 = scmp.ne.s32.totalorder %s217_s2, %s134_s11  ;;  %p138_p10 = scmp.lt.u32.totalorder %s134_s11, %s217_s2 }
  0x3b   :  { %p140_p11 = pnand %p138_p10, %p135_p9 }
  0x3d   :  { %143 = shalt.err (!%p140_p11)
}
  0x3e   :  { %67 = dma.vmem_to_hbm [thread:$0]  %s65_s8, 64, %s217_s2, [#allocation4]  }
  0x3f   :  { %148 = dma.done.wait [#allocation4], 64  }
  0x40   :  { %149 = vsyncadd [#allocation4], 4294967232 }
  0x41   :  { %71 = vsyncpa [#allocation3], 1 }
  0x42   :  { %72 = vsyncpa [#allocation6], 1 }
  0x43   :  { %73 = vsyncpa [#allocation4], 1 }

</bundles_post_ra>
